<compile_context>
chip_gen: v5e
topology: v5e:2x2
jax: 0.10.0
libtpu: 0.0.40
codegen_flags: <defaults>
</compile_context>

<pallas_src>
import numpy as np
import jax
import jax.numpy as jnp
from jax.experimental import pallas as pl
from jax.experimental.pallas import tpu as pltpu

_LANE = 128


def _drop_path_kernel(x_ref, s_ref, o_ref):
    # x_ref: (TB, TILE_R, 128), s_ref: (TB, 1, 1) per-sample scale (0 or 1/keep_prob)
    # Pure VPU broadcast-multiply in the input dtype (no upcast) -> HBM-bandwidth bound.
    o_ref[...] = x_ref[...] * s_ref[...]


def drop_path_pallas(x, key, drop_prob: float = 0.0, training: bool = False,
                     scale_by_keep: bool = True, block_bytes: int = 2 * 1024 * 1024):
    """Matches timm's drop_path / nnU-Net DropPath.forward semantics.

    `key` is a jax.random PRNG key used for the per-sample Bernoulli draw.
    """
    if drop_prob == 0.0 or not training:
        return x
    keep_prob = 1.0 - drop_prob

    B = x.shape[0]
    orig_shape = x.shape
    F = int(np.prod(orig_shape[1:]))

    # Per-sample keep/scale, computed in x.dtype (PyTorch divides in x.dtype too).
    keep = jax.random.bernoulli(key, p=keep_prob, shape=(B,))
    scale_val = (1.0 / keep_prob) if (scale_by_keep and keep_prob > 0.0) else 1.0
    scale = jnp.where(keep,
                      jnp.asarray(scale_val, x.dtype),
                      jnp.asarray(0.0, x.dtype)).reshape(B, 1, 1)

    pad = (-F) % _LANE
    if pad:
        # TODO(synk): rare non-multiple-of-128 feature size; this pad/slice costs
        # one extra HBM copy each way. Fast path below avoids it entirely.
        flat = jnp.pad(x.reshape(B, F), ((0, 0), (0, pad)))
    else:
        flat = x.reshape(B, F)  # free, contiguous view
    R = (F + pad) // _LANE
    x3 = flat.reshape(B, R, _LANE)

    # Tile sizing: target ~block_bytes per block; double-buffered in+out stays
    # well under the scoped-VMEM default on every generation (incl. v5e 16 MiB,
    # v7x 64 MiB physical / 32 MiB scoped).
    itemsize = x.dtype.itemsize
    rows_target = max(8, block_bytes // (_LANE * itemsize))
    if R <= rows_target:
        tile_r = R
        tb = min(B, max(1, rows_target // max(R, 1)))  # batch samples per block
    else:
        tile_r = max(8, (rows_target // 8) * 8)
        tb = 1
    grid = (pl.cdiv(B, tb), pl.cdiv(R, tile_r))

    out = pl.pallas_call(
        _drop_path_kernel,
        out_shape=jax.ShapeDtypeStruct((B, R, _LANE), x.dtype),
        grid_spec=pltpu.PrefetchScalarGridSpec(
            num_scalar_prefetch=0,
            grid=grid,
            in_specs=[
                pl.BlockSpec((tb, tile_r, _LANE), lambda i, j: (i, j, 0)),
                pl.BlockSpec((tb, 1, 1), lambda i, j: (i, 0, 0)),
            ],
            out_specs=pl.BlockSpec((tb, tile_r, _LANE), lambda i, j: (i, j, 0)),
        ),
        compiler_params=pltpu.CompilerParams(
            dimension_semantics=("parallel", "arbitrary")),
    )(x3, scale)

    if pad:
        out = out.reshape(B, -1)[:, :F]
    return out.reshape(orig_shape)


if __name__ == "__main__":
    key = jax.random.PRNGKey(0)
    kx, kd = jax.random.split(key)
    x = jax.random.normal(kx, (2, 4, 16, 16), dtype=jnp.float32)  # NCHW

    drop_prob = 0.25
    keep_prob = 1.0 - drop_prob

    # training=True path (stochastic, per-sample)
    y = drop_path_pallas(x, kd, drop_prob=drop_prob, training=True,
                         scale_by_keep=True)
    y = jax.block_until_ready(y)

    xn, yn = np.asarray(x), np.asarray(y)
    for b in range(x.shape[0]):
        is_dropped = np.allclose(yn[b], 0.0)
        is_scaled = np.allclose(yn[b], xn[b] / keep_prob, rtol=1e-5, atol=1e-5)
        assert is_dropped or is_scaled, "per-sample mask semantics violated"

    # exact match against a pure-JAX reference using the same key
    keep_ref = jax.random.bernoulli(kd, p=keep_prob, shape=(x.shape[0],))
    ref = x * jnp.where(keep_ref, 1.0 / keep_prob, 0.0).astype(x.dtype).reshape(-1, 1, 1, 1)
    assert np.allclose(np.asarray(ref), yn, rtol=1e-5, atol=1e-5)

    # bf16 path (no f32 upcast inside the kernel)
    xb = x.astype(jnp.bfloat16)
    yb = jax.block_until_ready(
        drop_path_pallas(xb, kd, drop_prob=drop_prob, training=True))
    assert yb.dtype == jnp.bfloat16
    ybn = np.asarray(yb.astype(jnp.float32))
    for b in range(x.shape[0]):
        assert np.allclose(ybn[b], 0.0) or np.allclose(
            ybn[b], np.asarray(xb.astype(jnp.float32))[b] / keep_prob,
            rtol=2e-2, atol=2e-2)

    # ragged (non multiple-of-128) feature size still works
    xr = jax.random.normal(kx, (2, 3, 5, 7), dtype=jnp.float32)
    yr = jax.block_until_ready(
        drop_path_pallas(xr, kd, drop_prob=drop_prob, training=True))
    xrn, yrn = np.asarray(xr), np.asarray(yr)
    for b in range(xr.shape[0]):
        assert np.allclose(yrn[b], 0.0) or np.allclose(
            yrn[b], xrn[b] / keep_prob, rtol=1e-5, atol=1e-5)

    # eval / drop_prob==0 path: identity
    y_eval = drop_path_pallas(x, kd, drop_prob=drop_prob, training=False)
    assert np.allclose(np.asarray(y_eval), xn)
    y_zero = drop_path_pallas(x, kd, drop_prob=0.0, training=True)
    assert np.allclose(np.asarray(y_zero), xn)

    print("KERNEL_OK")
</pallas_src>

<mosaic_0001>
module attributes {stable_mosaic.version = 11 : i64} {
  func.func @_drop_path_kernel(%arg0: i32, %arg1: i32, %arg2: memref<2x8x128xf32, #tpu.memory_space<vmem>>, %arg3: memref<2x1x1xf32, #tpu.memory_space<vmem>>, %arg4: memref<2x8x128xf32, #tpu.memory_space<vmem>>) attributes {dimension_semantics = [#tpu.dimension_semantics<parallel>, #tpu.dimension_semantics<arbitrary>], iteration_bounds = array<i64: 1, 1>, scalar_prefetch = 0 : i64, scratch_operands = 0 : i64, tpu.core_type = #tpu.core_type<tc>, window_params = [{transform_indices = @transform_0, window_bounds = array<i64: 2, 8, 128>}, {transform_indices = @transform_1, window_bounds = array<i64: 2, 1, 1>}, {transform_indices = @transform_2, window_bounds = array<i64: 2, 8, 128>}]} {
    %c0 = arith.constant 0 : index
    %c0_0 = arith.constant 0 : index
    %c0_1 = arith.constant 0 : index
    %0 = vector.load %arg2[%c0, %c0_0, %c0_1] : memref<2x8x128xf32, #tpu.memory_space<vmem>>, vector<2x8x128xf32>
    %c0_2 = arith.constant 0 : index
    %c0_3 = arith.constant 0 : index
    %c0_4 = arith.constant 0 : index
    %1 = vector.load %arg3[%c0_2, %c0_3, %c0_4] : memref<2x1x1xf32, #tpu.memory_space<vmem>>, vector<2x1x1xf32>
    %2 = vector.broadcast %1 : vector<2x1x1xf32> to vector<2x8x128xf32>
    %3 = arith.mulf %0, %2 : vector<2x8x128xf32>
    %c0_5 = arith.constant 0 : index
    %c0_6 = arith.constant 0 : index
    %c0_7 = arith.constant 0 : index
    %4 = vector.load %arg4[%c0_5, %c0_6, %c0_7] : memref<2x8x128xf32, #tpu.memory_space<vmem>>, vector<2x8x128xf32>
    tpu.vector_store %arg4[%c0_5, %c0_6, %c0_7], %3 {strides = array<i32>} : memref<2x8x128xf32, #tpu.memory_space<vmem>>, vector<2x8x128xf32>,
    return
  }
  func.func @transform_0(%arg0: i32, %arg1: i32) -> (i32, i32, i32) {
    %c0_i32 = arith.constant 0 : i32
    %c0_i32_0 = arith.constant 0 : i32
    return %arg0, %arg1, %c0_i32 : i32, i32, i32
  }
  func.func @transform_1(%arg0: i32, %arg1: i32) -> (i32, i32, i32) {
    %c0_i32 = arith.constant 0 : i32
    %c0_i32_0 = arith.constant 0 : i32
    %c0_i32_1 = arith.constant 0 : i32
    return %arg0, %c0_i32, %c0_i32_0 : i32, i32, i32
  }
  func.func @transform_2(%arg0: i32, %arg1: i32) -> (i32, i32, i32) {
    %c0_i32 = arith.constant 0 : i32
    %c0_i32_0 = arith.constant 0 : i32
    return %arg0, %arg1, %c0_i32 : i32, i32, i32
  }
}

</mosaic_0001>

<bundles_post_ra>
// kernel: tpu_custom_call.1
= control target key start
LH: loop header
LB: loop body
LE: loop exit
PB: predicated region body
PF: predicated region fallthrough
CT: control target
= control target key end

     0   :  { %7 = vsyncpa [#allocation3], 0  ;;  %s159_s0 = inlined_call_operand.hbm [shape: f32[2,8,128], index: 0, kind: input, shape index: {}]   ;;  %s160_s1 = inlined_call_operand.vmem [shape: f32[2,1,1], index: 1, kind: input, shape index: {}]   ;;  %s161_s2 = inlined_call_operand.hbm [shape: f32[2,8,128], index: 2, kind: output, shape index: {}]  }
   0x1   :  { %8 = vsyncpa [#allocation4], 0  ;;  %s13_s11 = sshll.u32 %s159_s0, 4  ;;  %s127_s12 = smov [#allocation2]   ;;  %s14_s11 = int_to_ptr.hbm [resolvable:$true] %s13_s11 }
   0x2   :  { %s15_s13 = sshll.u32 %s127_s12, 4  ;;  %s128_s14 = smov 128   ;;  %s16_s13 = int_to_ptr.vmem [resolvable:$true] %s15_s13 }
   0x3   :  { %s129_s15 = smov 8  }
   0x4   :  { %21 = dma.hbm_to_vmem [thread:$0]  %s14_s11, 256, %s16_s13, [#allocation3], %s128_s14, %s128_s14, %s129_s15  }
   0x5   :  { %123 = dma.done.wait [#allocation3], 256  }
   0x6   :  { %124 = vsyncadd [#allocation3], 4294967040  ;;  %v130_v0 = vmov 0   ;;  %v73_v1 = vld [vmem:[%s160_s1] ss:$0 sm:$0xff]  ;;  %v29_v6 = vld [vmem:[#allocation2 + $0x8] sm:$0xff] }
   0x7   :  { %72 = vset.pattern.permute.xlu0 %v130_v0  ;;  %v74_v2 = vld [vmem:[%s160_s1 + $0x1] ss:$0 sm:$0xff]  ;;  %s131_s0 = smov [#allocation5]   ;;  %s54_s23 = sshll.u32 %s161_s2, 4  ;;  %s55_s23 = int_to_ptr.hbm [resolvable:$true] %s54_s23 }
   0x8   :  { %37 = vperm.xlu0 %72, %v73_v1   ;;  %v28_v3 = vld [vmem:[#allocation2] sm:$0xff]  ;;  %s52_s20 = sshll.u32 %s131_s0, 4  ;;  %s53_s20 = int_to_ptr.vmem [resolvable:$true] %s52_s20 }
  0x10   :  { %41 = vperm.xlu0 %72, %v74_v2  }
  0x7a   :  { %v38_v4 = vpop.permute.xlu0 %37 }
  0x7b   :  { %v44_v5 = vmul.f32 %v38_v4, %v28_v3 }
  0x7d   :  { %46 = vst [vmem:[#allocation5] sm:$0xff] %v44_v5 }
  0x82   :  { %v42_v7 = vpop.permute.xlu0 %41 }
  0x83   :  { %v45_v8 = vmul.f32 %v42_v7, %v29_v6 }
  0x85   :  { %47 = vst [vmem:[#allocation5 + $0x8] sm:$0xff] %v45_v8 }
  0x86   :  { %60 = dma.vmem_to_hbm [thread:$0]  %s53_s20, 256, %s55_s23, [#allocation4], %s128_s14, %s128_s14, %s129_s15  }
  0x87   :  { %125 = dma.done.wait [#allocation4], 256  }
  0x88   :  { %126 = vsyncadd [#allocation4], 4294967040 }
  0x89   :  { %65 = vsyncpa [#allocation3], 1 }
  0x8a   :  { %66 = vsyncpa [#allocation4], 1 }

</bundles_post_ra>
